<compile_context>
chip_gen: v7x
topology: tpu7x:2x2x1
jax: 0.10.0
libtpu: 0.0.40
codegen_flags: <defaults>
</compile_context>

<pallas_src>
import math
import numpy as np
import jax
import jax.numpy as jnp
from jax import lax
from jax.experimental import pallas as pl
from jax.experimental.pallas import tpu as pltpu

KSIZE = 31
PAD = 15


def gkern(kernlen=16, nsig=3):
    """Same construction as the PyTorch module (scipy-free normal CDF via erf)."""
    interval = (2 * nsig + 1.0) / kernlen
    x = np.linspace(-nsig - interval / 2.0, nsig + interval / 2.0, kernlen + 1)
    cdf = np.array([0.5 * (1.0 + math.erf(v / math.sqrt(2.0))) for v in x])
    kern1d = np.diff(cdf)
    kernel_raw = np.sqrt(np.outer(kern1d, kern1d))
    kernel = kernel_raw / kernel_raw.sum()
    return kernel


def separable_taps(kernlen=31, nsig=4):
    """1-D taps t such that gkern(kernlen, nsig) == outer(t, t) exactly."""
    interval = (2 * nsig + 1.0) / kernlen
    x = np.linspace(-nsig - interval / 2.0, nsig + interval / 2.0, kernlen + 1)
    cdf = np.array([0.5 * (1.0 + math.erf(v / math.sqrt(2.0))) for v in x])
    kern1d = np.diff(cdf)
    s = np.sqrt(kern1d)
    return (s / s.sum()).astype(np.float64)


def band_matrix(n, taps):
    """B[i, j] = taps[j - i + PAD]; zero outside the 31-tap band (implicit zero pad)."""
    b = np.zeros((n, n), np.float64)
    for i in range(n):
        lo = max(0, i - PAD)
        hi = min(n, i + PAD + 1)
        for j in range(lo, hi):
            b[i, j] = taps[j - i + PAD]
    return np.float32(b)


def _pick_channel_tile(C, H, W, itemsize, budget_bytes=4 * 1024 * 1024):
    """Largest divisor of C whose (CT, H, W) plane stack fits the per-buffer budget."""
    plane = H * W * itemsize
    best = 1
    for d in range(1, C + 1):
        if C % d == 0 and d * plane <= budget_bytes:
            best = d
    return best


def ha_kernel(bh_ref, bwt_ref, attn_ref, x_ref, o_ref, m_ref):
    # bh_ref:   (H, H)        banded row filter        (VMEM, resident)
    # bwt_ref:  (W, W)        banded column filter^T   (VMEM, resident)
    # attn_ref: (1, H, W)     attention, one batch     (VMEM, resident across c)
    # x_ref:    (1, CT, H, W) feature tile
    # o_ref:    (1, CT, H, W) output tile
    # m_ref:    (H, W) f32    persistent VMEM scratch holding max(soft, attn)
    c_idx = pl.program_id(1)

    @pl.when(c_idx == 0)
    def _():
        a = attn_ref[0].astype(jnp.float32)                      # (H, W)
        # Separable 31x31 gaussian conv (pad=15) as two MXU matmuls.
        tmp = jnp.dot(bh_ref[...], a,
                      preferred_element_type=jnp.float32,
                      precision=lax.Precision.HIGHEST)           # (H, W)
        conv = jnp.dot(tmp, bwt_ref[...],
                       preferred_element_type=jnp.float32,
                       precision=lax.Precision.HIGHEST)          # (H, W)
        # min_max_norm over the spatial plane (single channel, per batch).
        mn = jnp.min(conv)
        mx = jnp.max(conv)
        inv = 1.0 / (mx - mn + 1e-8)                             # one scalar recip
        soft = (conv - mn) * inv
        m_ref[...] = jnp.maximum(soft, a)

    m = m_ref[...]
    o_ref[...] = (x_ref[...] * m[None, None, :, :]).astype(o_ref.dtype)


def ha_forward(attention, x):
    """attention: (B,1,H,W), x: (B,C,H,W) -> (B,C,H,W)."""
    B, Ca, H, W = attention.shape
    assert Ca == 1, "HA expects a single-channel attention map"
    _, C, _, _ = x.shape

    taps = separable_taps(KSIZE, 4)
    bh = jnp.asarray(band_matrix(H, taps))        # (H, H)
    bwt = jnp.asarray(band_matrix(W, taps).T)     # (W, W)
    attn2 = attention[:, 0]                       # (B, H, W) — no padded copy needed

    ct = _pick_channel_tile(C, H, W, jnp.dtype(x.dtype).itemsize)
    nc = C // ct

    return pl.pallas_call(
        ha_kernel,
        out_shape=jax.ShapeDtypeStruct((B, C, H, W), x.dtype),
        grid_spec=pltpu.PrefetchScalarGridSpec(
            num_scalar_prefetch=0,
            grid=(B, nc),
            in_specs=[
                pl.BlockSpec((H, H), lambda b, c: (0, 0)),           # Bh (resident)
                pl.BlockSpec((W, W), lambda b, c: (0, 0)),           # Bw^T (resident)
                pl.BlockSpec((1, H, W), lambda b, c: (b, 0, 0)),     # attention plane
                pl.BlockSpec((1, ct, H, W), lambda b, c: (b, c, 0, 0)),  # x tile
            ],
            out_specs=pl.BlockSpec((1, ct, H, W), lambda b, c: (b, c, 0, 0)),
            scratch_shapes=[pltpu.VMEM((H, W), jnp.float32)],
        ),
        compiler_params=pltpu.CompilerParams(
            dimension_semantics=("parallel", "arbitrary"),
            vmem_limit_bytes=32 * 1024 * 1024,
        ),
    )(bh, bwt, attn2, x)


def ha_reference(attention, x, gk):
    """Pure-JAX reference mirroring the PyTorch forward (full 31x31 conv)."""
    conv = lax.conv_general_dilated(
        attention, gk[None, None].astype(attention.dtype),
        window_strides=(1, 1), padding=((PAD, PAD), (PAD, PAD)),
        dimension_numbers=("NCHW", "OIHW", "NCHW"))
    mx = conv.max(axis=(2, 3), keepdims=True)
    mn = conv.min(axis=(2, 3), keepdims=True)
    soft = (conv - mn) / (mx - mn + 1e-8)
    return x * jnp.maximum(soft, attention)


if __name__ == "__main__":
    key = jax.random.PRNGKey(0)
    k1, k2 = jax.random.split(key)

    B, C, H, W = 2, 4, 16, 16
    attention = jax.random.uniform(k1, (B, 1, H, W), dtype=jnp.float32)
    x = jax.random.normal(k2, (B, C, H, W), dtype=jnp.float32)

    out = ha_forward(attention, x)
    out = jax.block_until_ready(out)

    gk = jnp.asarray(np.float32(gkern(31, 4)))
    ref = ha_reference(attention, x, gk)
    np.testing.assert_allclose(np.asarray(out), np.asarray(ref), rtol=1e-4, atol=1e-5)

    print("KERNEL_OK")
</pallas_src>

<mosaic_0001>
module attributes {stable_mosaic.version = 11 : i64} {
  func.func @ha_kernel(%arg0: i32, %arg1: i32, %arg2: memref<16x16xf32, #tpu.memory_space<vmem>>, %arg3: memref<16x16xf32, #tpu.memory_space<vmem>>, %arg4: memref<1x16x16xf32, #tpu.memory_space<vmem>>, %arg5: memref<1x4x16x16xf32, #tpu.memory_space<vmem>>, %arg6: memref<1x4x16x16xf32, #tpu.memory_space<vmem>>, %arg7: memref<16x16xf32, #tpu.memory_space<vmem>>) attributes {dimension_semantics = [#tpu.dimension_semantics<parallel>, #tpu.dimension_semantics<arbitrary>], iteration_bounds = array<i64: 2, 1>, scalar_prefetch = 0 : i64, scratch_operands = 1 : i64, tpu.core_type = #tpu.core_type<tc>, window_params = [{pipeline_mode = #tpu.pipeline_mode<synchronous>, transform_indices = @transform_0, window_bounds = array<i64: 16, 16>}, {pipeline_mode = #tpu.pipeline_mode<synchronous>, transform_indices = @transform_1, window_bounds = array<i64: 16, 16>}, {transform_indices = @transform_2, window_bounds = array<i64: 1, 16, 16>}, {transform_indices = @transform_3, window_bounds = array<i64: 1, 4, 16, 16>}, {transform_indices = @transform_4, window_bounds = array<i64: 1, 4, 16, 16>}]} {
    %c0_i32 = arith.constant 0 : i32
    %0 = arith.cmpi eq, %arg1, %c0_i32 : i32
    %1 = arith.extui %0 : i1 to i32
    %c0_i32_0 = arith.constant 0 : i32
    %2 = arith.cmpi ne, %1, %c0_i32_0 : i32
    scf.if %2 {
      %c0_10 = arith.constant 0 : index
      %c0_11 = arith.constant 0 : index
      %c0_12 = arith.constant 0 : index
      %9 = vector.load %arg4[%c0_10, %c0_11, %c0_12] : memref<1x16x16xf32, #tpu.memory_space<vmem>>, vector<1x16x16xf32>
      %10 = vector.shape_cast %9 : vector<1x16x16xf32> to vector<16x16xf32>
      %c0_13 = arith.constant 0 : index
      %c0_14 = arith.constant 0 : index
      %11 = vector.load %arg2[%c0_13, %c0_14] : memref<16x16xf32, #tpu.memory_space<vmem>>, vector<16x16xf32>
      %cst = arith.constant dense<0.000000e+00> : vector<16x16xf32>
      %12 = tpu.matmul %11, %10, %cst {dimension_numbers = #tpu.dot_dimension_numbers<[1], [0], [0], [1], [0, 0, 1, 1], [], []>, precision = #tpu.contract_precision<fp32>} : vector<16x16xf32>, vector<16x16xf32>, vector<16x16xf32> -> vector<16x16xf32>
      %c0_15 = arith.constant 0 : index
      %c0_16 = arith.constant 0 : index
      %13 = vector.load %arg3[%c0_15, %c0_16] : memref<16x16xf32, #tpu.memory_space<vmem>>, vector<16x16xf32>
      %cst_17 = arith.constant dense<0.000000e+00> : vector<16x16xf32>
      %14 = tpu.matmul %12, %13, %cst_17 {dimension_numbers = #tpu.dot_dimension_numbers<[1], [0], [0], [1], [0, 0, 1, 1], [], []>, precision = #tpu.contract_precision<fp32>} : vector<16x16xf32>, vector<16x16xf32>, vector<16x16xf32> -> vector<16x16xf32>
      %15 = vector.shape_cast %14 : vector<16x16xf32> to vector<1x16x16xf32>
      %cst_18 = arith.constant dense<0x7F800000> : vector<1xf32>
      %16 = vector.multi_reduction <minimumf>, %15, %cst_18 [1, 2] : vector<1x16x16xf32> to vector<1xf32>
      %17 = vector.shape_cast %16 : vector<1xf32> to vector<1x1x1xf32>
      %18 = vector.extract %17[0, 0, 0] : f32 from vector<1x1x1xf32>
      %19 = vector.shape_cast %14 : vector<16x16xf32> to vector<1x16x16xf32>
      %cst_19 = arith.constant dense<0xFF800000> : vector<1xf32>
      %20 = vector.multi_reduction <maximumf>, %19, %cst_19 [1, 2] : vector<1x16x16xf32> to vector<1xf32>
      %21 = vector.shape_cast %20 : vector<1xf32> to vector<1x1x1xf32>
      %22 = vector.extract %21[0, 0, 0] : f32 from vector<1x1x1xf32>
      %23 = arith.subf %22, %18 : f32
      %cst_20 = arith.constant 9.99999993E-9 : f32
      %24 = arith.addf %23, %cst_20 : f32
      %cst_21 = arith.constant 1.000000e+00 : f32
      %25 = arith.divf %cst_21, %24 : f32
      %26 = vector.broadcast %18 : f32 to vector<16x16xf32>
      %27 = arith.subf %14, %26 : vector<16x16xf32>
      %28 = vector.broadcast %25 : f32 to vector<16x16xf32>
      %29 = arith.mulf %27, %28 : vector<16x16xf32>
      %30 = arith.maximumf %29, %10 : vector<16x16xf32>
      %c0_22 = arith.constant 0 : index
      %c0_23 = arith.constant 0 : index
      %31 = vector.load %arg7[%c0_22, %c0_23] : memref<16x16xf32, #tpu.memory_space<vmem>>, vector<16x16xf32>
      tpu.vector_store %arg7[%c0_22, %c0_23], %30 {strides = array<i32>} : memref<16x16xf32, #tpu.memory_space<vmem>>, vector<16x16xf32>,
    } else {
    }
    %c0 = arith.constant 0 : index
    %c0_1 = arith.constant 0 : index
    %3 = vector.load %arg7[%c0, %c0_1] : memref<16x16xf32, #tpu.memory_space<vmem>>, vector<16x16xf32>
    %c0_2 = arith.constant 0 : index
    %c0_3 = arith.constant 0 : index
    %c0_4 = arith.constant 0 : index
    %c0_5 = arith.constant 0 : index
    %4 = vector.load %arg5[%c0_2, %c0_3, %c0_4, %c0_5] : memref<1x4x16x16xf32, #tpu.memory_space<vmem>>, vector<1x4x16x16xf32>
    %5 = vector.shape_cast %3 : vector<16x16xf32> to vector<1x1x16x16xf32>
    %6 = vector.broadcast %5 : vector<1x1x16x16xf32> to vector<1x4x16x16xf32>
    %7 = arith.mulf %4, %6 : vector<1x4x16x16xf32>
    %c0_6 = arith.constant 0 : index
    %c0_7 = arith.constant 0 : index
    %c0_8 = arith.constant 0 : index
    %c0_9 = arith.constant 0 : index
    %8 = vector.load %arg6[%c0_6, %c0_7, %c0_8, %c0_9] : memref<1x4x16x16xf32, #tpu.memory_space<vmem>>, vector<1x4x16x16xf32>
    tpu.vector_store %arg6[%c0_6, %c0_7, %c0_8, %c0_9], %7 {strides = array<i32>} : memref<1x4x16x16xf32, #tpu.memory_space<vmem>>, vector<1x4x16x16xf32>,
    return
  }
  func.func @transform_0(%arg0: i32, %arg1: i32) -> (i32, i32) {
    %c0_i32 = arith.constant 0 : i32
    %c0_i32_0 = arith.constant 0 : i32
    %c0_i32_1 = arith.constant 0 : i32
    return %c0_i32, %c0_i32_0 : i32, i32
  }
  func.func @transform_1(%arg0: i32, %arg1: i32) -> (i32, i32) {
    %c0_i32 = arith.constant 0 : i32
    %c0_i32_0 = arith.constant 0 : i32
    %c0_i32_1 = arith.constant 0 : i32
    return %c0_i32, %c0_i32_0 : i32, i32
  }
  func.func @transform_2(%arg0: i32, %arg1: i32) -> (i32, i32, i32) {
    %c0_i32 = arith.constant 0 : i32
    %c0_i32_0 = arith.constant 0 : i32
    %c0_i32_1 = arith.constant 0 : i32
    return %arg0, %c0_i32, %c0_i32_0 : i32, i32, i32
  }
  func.func @transform_3(%arg0: i32, %arg1: i32) -> (i32, i32, i32, i32) {
    %c0_i32 = arith.constant 0 : i32
    %c0_i32_0 = arith.constant 0 : i32
    %c0_i32_1 = arith.constant 0 : i32
    return %arg0, %arg1, %c0_i32, %c0_i32_0 : i32, i32, i32, i32
  }
  func.func @transform_4(%arg0: i32, %arg1: i32) -> (i32, i32, i32, i32) {
    %c0_i32 = arith.constant 0 : i32
    %c0_i32_0 = arith.constant 0 : i32
    %c0_i32_1 = arith.constant 0 : i32
    return %arg0, %arg1, %c0_i32, %c0_i32_0 : i32, i32, i32, i32
  }
}

</mosaic_0001>

<bundles_post_ra>
// kernel: tpu_custom_call.1
= control target key start
LH: loop header
LB: loop body
LE: loop exit
PB: predicated region body
PF: predicated region fallthrough
CT: control target
= control target key end

     0   :  { %s2441_s0 = inlined_call_operand.hbm [shape: f32[16,16], index: 0, kind: input, shape index: {}]   ;;  %s2442_s1 = inlined_call_operand.hbm [shape: f32[16,16], index: 1, kind: input, shape index: {}]   ;;  %s2443_s2 = inlined_call_operand.hbm [shape: f32[2,16,16], index: 2, kind: input, shape index: {}]   ;;  %s2444_s3 = inlined_call_operand.hbm [shape: f32[2,4,16,16], index: 3, kind: input, shape index: {}]   ;;  %s2445_s4 = inlined_call_operand.hbm [shape: f32[2,4,16,16], index: 4, kind: output, shape index: {}]  }
   0x1   :  { %2458 = sst [smem:[#allocation18_spill]] %s2441_s0 }
   0x2   :  { %2459 = sst [smem:[#allocation19_spill]] %s2443_s2 }
   0x3   :  { %9 = vsyncpa [#allocation4], 0 }
   0x4   :  { %10 = vsyncpa [#allocation7], 0 }
   0x5   :  { %11 = vsyncpa [#allocation5], 0 }
   0x6   :  { %13 = vsyncpa [#allocation5 + $0x1], 0  ;;  %s2105_s15 = smov 0   ;;  %s2107_s16 = smov 0  }
   0x7   :  { %s2109_s17 = smov 0   ;;  %s2111_s18 = smov 0  }
   0x8   :  { %s2113_s19 = smov 0   ;;  %s2115_s20 = smov 0  }
   0x9 LB: > { %2460 = sst [smem:[#allocation15_spill]] %s2049_s15  ;;  %s2136_s21 = sadd.s32 4294967295, %s2069_s20   ;;  %s2069_s20 = sphi %s2115_s20, %s19_s20   ;;  %s2065_s19 = sphi %s2113_s19, %s2495_s19   ;;  %s2061_s18 = sphi %s2111_s18, %s2494_s18   ;;  %s2057_s17 = sphi %s2109_s17, %s2493_s17   ;;  %s2053_s16 = sphi %s2107_s16, %s2492_s16   ;;  %s2049_s15 = sphi %s2105_s15, %s2491_s15  }
   0xa   : > { %s1538_s22 = sadd.s32 4294967294, %s2069_s20   ;;  %p87_p0 = scmp.ne.s32.totalorder %s2057_s17, %s2053_s16 }
   0xb   : > { %p88_p1 = scmp.eq.s32.totalorder %s2069_s20, 0  ;;  %p93_p2 = scmp.ne.s32.totalorder %s2053_s16, %s2049_s15 }
   0xc   : > { %p2446_p3 = scmp.eq.s32.totalorder %s2136_s21, 0  ;;  %p147_p4 = scmp.eq.s32.totalorder %s2136_s21, 1 }
   0xd   : > { %p2147_p5 = por %p88_p1, %p87_p0  ;;  %p153_p6 = scmp.eq.s32.totalorder %s1538_s22, 1 }
   0xe   : > { %p2153_p7 = por %p2446_p3, %p93_p2  ;;  %p2157_p8 = por %p147_p4, %p87_p0 }
   0xf   : > { %p2161_p9 = por %p153_p6, %p93_p2  ;;  %p1539_p10 = scmp.ge.s32.totalorder %s2069_s20, 1 }
  0x10   : > { %s2462_s25 = scalar_select %p2153_p7, 1, 0 }
  0x11   : > { %s2463_s26 = scalar_select %p2157_p8, 1, 0 }
  0x12   : > { %s2465_s27 = scalar_select %p2161_p9, 1, 0 }
  0x13   : > { %2464 = sst [smem:[#allocation16_spill]] %s2463_s26  ;;  %p160_p11 = scmp.lt.s32.totalorder %s2069_s20, 3 }
  0x14   : > { %2466 = sst [smem:[#allocation17_spill]] %s2465_s27  ;;  %s2071_s29 = smov [#allocation3]  }
  0x15   : > { %p2167_p12 = pnand %p1539_p10, %p160_p11  ;;  %s172_s30 = sshll.u32 %s2071_s29, 4  ;;  %s2171_s30 = int_to_ptr.vmem [resolvable:$true] %s172_s30 }
  0x16   : > { %p1803_p1 = scmp.lt.s32.totalorder %s2069_s20, 2  ;;  %s31_s7 = sadd.s32 1, %s2065_s19 }
  0x17   : > { %s2467_s28 = scalar_select %p2167_p12, 1, 0 }
  0x18   : > { %p1783_p13 = pneg %p2167_p12  ;;  %p2185_p4 = pnand %p1803_p1, %p2147_p5 }
  0x19   : > { %p2190_p6 = scmp.ge.s32.totalorder %s31_s7, 2  ;;  %s2471_s0 = sld [smem:[#allocation18_spill]] }
  0x1a   : > { %p2179_p2 = pnand %p1783_p13, %p2446_p3 }
  0x1b   : > { %s2469_s6 = scalar_select %p2185_p4, 1, 0 }
  0x1c   : > { %p2454_p11 = pneg %p2179_p2 }
  0x1f   : > { %s1863_s11 = scalar_lea.hbm %s2471_s0, 256 }
  0x20   : > { %p1864_p10 = scmp.ne.s32.totalorder %s2471_s0, %s1863_s11  ;;  %p1870_p1 = scmp.lt.u32.totalorder %s1863_s11, %s2471_s0 }
  0x22   : > { %p1866_p5 = pnand %p2454_p11, %p1864_p10 }
  0x24   : > { %p1867_p13 = pneg %p1866_p5 }
  0x26   : > { %p1872_p0 = pnand %p1870_p1, %p1867_p13 }
  0x28   : > { %1875 = shalt.err (!%p1872_p0)
}
  0x29   : > { %s1876_s24 = scalar_lea.vmem %s2171_s30, 256  ;;  %p1884_p7 = scmp.lt.s32.totalorder %s2171_s30, %s2171_s30 }
  0x2a   : > { %p1877_p3 = scmp.ne.s32.totalorder %s2171_s30, %s1876_s24  ;;  %p1885_p10 = scmp.lt.s32.totalorder %s1876_s24, %s1876_s24 }
  0x2c   : > { %p1879_p9 = pnand %p1877_p3, %p2454_p11  ;;  %p1886_p5 = por %p1885_p10, %p1884_p7 }
  0x2e   : > { %p1880_p8 = pneg %p1879_p9 }
  0x30   : > { %p1887_p12 = pnand %p1886_p5, %p1880_p8 }
  0x32   : > { %1890 = shalt.err (!%p1887_p12)
}
  0x33   : > { %s2072_s29 = smov 128   ;;  %s2073_s9 = smov 8  }
  0x34   : > { %1786 = dma.hbm_to_vmem [thread:$0]  (!%p2179_p2), %s2471_s0, 256, %s2171_s30, [#allocation4], %s2072_s29, %s2072_s29, %s2073_s9  }
  0x35   : > { %s199_s12 = sand.u32 1, %s2069_s20   ;;  %s2497_s7 = smov (%p2190_p6, %s31_s7), 0 }
  0x36   : > { %s201_s13 = sand.u32 1, %s2057_s17   ;;  %s77_s14 = ssub.s32 %s2065_s19, %s2497_s7 }
  0x37   : > { %s1543_s22 = sshll.u32 %s201_s13, 4  ;;  %p78_p3 = scmp.eq.s32.totalorder %s77_s14, 0 }
  0x38   : > { %s1560_s24 = sshll.u32 %s2065_s19, 8  ;;  %s203_s23 = scalar_lea.vmem [#allocation8], %s1543_s22 }
  0x39   : > { %s210_s27 = sshll.u32 %s203_s23, 4  ;;  %s2472_s15 = sadd.s32 1, %s2057_s17  ;;  %s2245_s27 = int_to_ptr.vmem [resolvable:$true] %s210_s27 }
  0x3a   : > { %s2238_s26 = scalar_select %p78_p3, %s2057_s17, %s2472_s15  }
  0x3b   : > { %s2473_s2 = sld [smem:[#allocation19_spill]]  ;;  %s2247_s8 = scalar_lea.sflag [#allocation4], %s199_s12 }
  0x3c   : > { %p2455_p8 = pneg %p2185_p4 }
  0x41   : > { %s2243_s11 = scalar_lea.hbm %s2473_s2, %s1560_s24  ;;  %s1896_s22 = scalar_lea.hbm %s2473_s2, 512 }
  0x42   : > { %s1891_s14 = scalar_lea.hbm %s2243_s11, 256  ;;  %p1897_p0 = scmp.lt.u32.totalorder %s2243_s11, %s2473_s2 }
  0x43   : > { %p1892_p7 = scmp.ne.s32.totalorder %s2243_s11, %s1891_s14  ;;  %p1898_p6 = scmp.lt.u32.totalorder %s1896_s22, %s1891_s14 }
  0x44   : > { %p1900_p1 = scmp.lt.u32.totalorder %s1891_s14, %s2243_s11 }
  0x45   : > { %p1894_p9 = pnand %p2455_p8, %p1892_p7  ;;  %p1899_p13 = por %p1898_p6, %p1897_p0 }
  0x47   : > { %p1895_p12 = pneg %p1894_p9  ;;  %p1901_p10 = por %p1900_p1, %p1899_p13 }
  0x49   : > { %p1902_p5 = pnand %p1901_p10, %p1895_p12 }
  0x4b   : > { %1905 = shalt.err (!%p1902_p5)
}
  0x4c   : > { %s1906_s12 = scalar_lea.vmem %s2245_s27, 256  ;;  %s2074_s30 = smov [#allocation8]  }
  0x4d   : > { %p1907_p3 = scmp.ne.s32.totalorder %s2245_s27, %s1906_s12  ;;  %s1911_s15 = sshll.u32 %s2074_s30, 4  ;;  %s1912_s15 = int_to_ptr.vmem [resolvable:$false] %s1911_s15 }
  0x4e   : > { %s1913_s23 = scalar_lea.vmem %s1912_s15, 512  ;;  %p1914_p11 = scmp.lt.s32.totalorder %s2245_s27, %s1912_s15 }
  0x4f   : > { %p1909_p7 = pnand %p1907_p3, %p2455_p8  ;;  %p1915_p0 = scmp.lt.s32.totalorder %s1913_s23, %s1906_s12 }
  0x51   : > { %p1910_p9 = pneg %p1909_p7  ;;  %p1916_p6 = por %p1915_p0, %p1914_p11 }
  0x53   : > { %p1917_p13 = pnand %p1916_p6, %p1910_p9 }
  0x55   : > { %1920 = shalt.err (!%p1917_p13)
}
  0x56   : > { %1793 = dma.hbm_to_vmem [thread:$0]  (!%p2185_p4), %s2243_s11, 256, %s2245_s27, %s2247_s8, %s2072_s29, %s2072_s29, %s2073_s9  }
  0x57   : > { %s1546_s14 = sshll.u32 %s201_s13, 6  ;;  %s2075_s22 = smov [#allocation6]  }
  0x58   : > { %s185_s24 = sshll.u32 %s2075_s22, 4  ;;  %s1561_s10 = sshll.u32 %s2065_s19, 10  ;;  %s186_s24 = int_to_ptr.vmem [resolvable:$true] %s185_s24 }
  0x59   : > { %s1921_s15 = scalar_lea.hbm %s2442_s1, 256  ;;  %p2474_p12 = pneg %p2179_p2 }
  0x5a   : > { %p1922_p11 = scmp.ne.s32.totalorder %s2442_s1, %s1921_s15  ;;  %p1928_p5 = scmp.lt.u32.totalorder %s1921_s15, %s2442_s1 }
  0x5c   : > { %p1924_p1 = pnand %p1922_p11, %p2474_p12 }
  0x5e   : > { %p1925_p10 = pneg %p1924_p1 }
  0x60   : > { %p1930_p3 = pnand %p1928_p5, %p1925_p10 }
  0x62   : > { %1933 = shalt.err (!%p1930_p3)
}
  0x63   : > { %s1934_s13 = scalar_lea.vmem %s186_s24, 256  ;;  %p2475_p9 = pmov %p2474_p12 }
  0x64   : > { %p1935_p7 = scmp.ne.s32.totalorder %s186_s24, %s1934_s13  ;;  %p1942_p13 = scmp.lt.s32.totalorder %s186_s24, %s186_s24 }
  0x65   : > { %p1943_p8 = scmp.lt.s32.totalorder %s1934_s13, %s1934_s13 }
  0x66   : > { %p1937_p0 = pnand %p1935_p7, %p2475_p9 }
  0x67   : > { %p1944_p4 = por %p1943_p8, %p1942_p13 }
  0x68   : > { %p1938_p6 = pneg %p1937_p0 }
  0x6a   : > { %p1945_p11 = pnand %p1944_p4, %p1938_p6 }
  0x6c   : > { %1948 = shalt.err (!%p1945_p11)
}
  0x6d   : > { %1789 = dma.hbm_to_vmem [thread:$0]  (!%p2179_p2), %s2442_s1, 256, %s186_s24, [#allocation7], %s2072_s29, %s2072_s29, %s2073_s9  }
  0x6e   : > { %s2307_s12 = scalar_lea.hbm %s2444_s3, %s1561_s10  ;;  %s224_s30 = scalar_lea.vmem [#allocation9], %s1546_s14 }
  0x6f   : > { %s234_s15 = sshll.u32 %s224_s30, 4  ;;  %s1949_s5 = scalar_lea.hbm %s2307_s12, 1024  ;;  %s2309_s15 = int_to_ptr.vmem [resolvable:$true] %s234_s15 }
  0x70   : > { %p1950_p4 = scmp.ne.s32.totalorder %s2307_s12, %s1949_s5  ;;  %p2476_p8 = scmp.ne.s32.totalorder %s2469_s6, 0 }
  0x71   : > { %s1954_s27 = scalar_lea.hbm %s2444_s3, 2048  ;;  %p1955_p2 = scmp.lt.u32.totalorder %s2307_s12, %s2444_s3 }
  0x72   : > { %p2477_p12 = pneg %p2476_p8  ;;  %p1956_p5 = scmp.lt.u32.totalorder %s1954_s27, %s1949_s5 }
  0x73   : > { %p1958_p7 = scmp.lt.u32.totalorder %s1949_s5, %s2307_s12 }
  0x74   : > { %p1952_p1 = pnand %p1950_p4, %p2477_p12  ;;  %p1957_p3 = por %p1956_p5, %p1955_p2 }
  0x76   : > { %p1953_p10 = pneg %p1952_p1  ;;  %p1959_p9 = por %p1958_p7, %p1957_p3 }
  0x78   : > { %p1960_p0 = pnand %p1959_p9, %p1953_p10 }
  0x7a   : > { %1963 = shalt.err (!%p1960_p0)
}
  0x7b   : > { %s1964_s14 = scalar_lea.vmem %s2309_s15, 1024  ;;  %p2478_p13 = pmov %p2477_p12 }
  0x7c   : > { %p1965_p6 = scmp.ne.s32.totalorder %s2309_s15, %s1964_s14  ;;  %s2076_s0 = smov [#allocation9]  }
  0x7d   : > { %s1969_s2 = sshll.u32 %s2076_s0, 4  ;;  %s1970_s2 = int_to_ptr.vmem [resolvable:$false] %s1969_s2 }
  0x7e   : > { %p1967_p11 = pnand %p1965_p6, %p2478_p13  ;;  %s1971_s11 = scalar_lea.vmem %s1970_s2, 2048 }
  0x7f   : > { %p1972_p12 = scmp.lt.s32.totalorder %s2309_s15, %s1970_s2  ;;  %p1973_p1 = scmp.lt.s32.totalorder %s1971_s11, %s1964_s14 }
  0x80   : > { %p1968_p4 = pneg %p1967_p11 }
  0x81   : > { %p1974_p2 = por %p1973_p1, %p1972_p12 }
  0x83   : > { %p1975_p5 = pnand %p1974_p2, %p1968_p4 }
  0x85   : > { %1978 = shalt.err (!%p1975_p5)
}
  0x86   : > { %1796 = dma.hbm_to_vmem [thread:$0]  (!%p2476_p8), %s2307_s12, 1024, %s2309_s15, %s2247_s8, %s2072_s29, %s2072_s29, %s2073_s9  }
  0x87   : > { %p2479_p10 = scmp.ne.s32.totalorder %s2467_s28, 0 }
  0x88   : > { %p2480_p3 = scmp.eq.s32.totalorder (!%p2479_p10), %s2136_s21, 0 }
  0x89   : > { %246 = sbr.rel (%p2479_p10) target bundleno = 995 (0x3e3), region = 36 }
  0x90   : > { %2032 = dma.done.wait (%p2480_p3), [#allocation4], 256   ;;  %p2481_p7 = pmov %p2480_p3 }
  0x91   : > { %p2482_p9 = pmov %p2480_p3 }
  0x92   : > { %2034 = vsyncadd (%p2481_p7), [#allocation4], 4294967040 }
  0x93   : > { %2036 = dma.done.wait (%p2482_p9), [#allocation7], 256   ;;  %p2483_p0 = pmov %p2480_p3 }
  0x94   : > { %s256_s6 = sand.u32 1, %s2136_s21   ;;  %s2350_s29 = sand.u32 1, %s2053_s16  }
  0x95   : > { %2038 = vsyncadd (%p2483_p0), [#allocation7], 4294967040  ;;  %s1552_s28 = sshll.u32 %s2350_s29, 4  ;;  %s257_s9 = scalar_lea.sflag [#allocation4], %s256_s6 }
  0x96   : > { %s260_s8 = scalar_lea.vmem [#allocation8], %s1552_s28  ;;  %p2484_p8 = scmp.ne.s32.totalorder %s2462_s25, 0 }
  0x98   : > { %2040 = dma.done.wait (%p2484_p8), %s257_s9, 1280  }
  0x99   : > { %2042 = vsyncadd (%p2484_p8), %s257_s9, 4294966016  ;;  %vm309_vm0 = vcmask 130048   ;;  %v2357_v0 = vld [vmem:[%s260_s8] sm:$0xff]  ;;  %v2359_v1 = vld [vmem:[%s260_s8 + $0x8] sm:$0xff]  ;;  %s1553_s15 = sshll.u32 %s2350_s29, 6  ;;  %s1562_s24 = sshll.u32 %s2061_s18, 10 }
  0x9a   : > { %v307_v2 = vld [vmem:[#allocation3] sm:$0xff]  ;;  %v317_v3 = vand.u32 4294901760, %v2357_v0  ;;  %v320_v4 = vand.u32 4294901760, %v2359_v1  ;;  %v308_v6 = vld [vmem:[#allocation3 + $0x8] sm:$0xff]  ;;  %v818_v30 = vld [vmem:[#allocation6] sm:$0xff]  ;;  %s269_s5 = scalar_lea.vmem [#allocation9], %s1553_s15  ;;  %s2382_s14 = scalar_lea.hbm %s2445_s4, %s1562_s24 }
  0x9b   : > { %v311_v5 = vsel %vm309_vm0, %v307_v2, 0  ;;  %v314_v8 = vsel %vm309_vm0, %v308_v6, 0  ;;  %v819_v31 = vld [vmem:[#allocation6 + $0x8] sm:$0xff]  ;;  %v827_v32 = vand.u32 4294901760, %v818_v30  ;;  %s298_s23 = scalar_lea.vmem [#allocation10], %s1553_s15  ;;  %s2485_s18 = sld [smem:[#allocation16_spill]] }
  0x9c   : > { %v383_v7 = vand.u32 4294901760, %v311_v5  ;;  %v1695_v9 = vpack.c.bf16 %v320_v4, %v317_v3  ;;  %v393_v10 = vand.u32 4294901760, %v314_v8  ;;  %v405_v11 = vsub.f32 %v2357_v0, %v317_v3  ;;  %s1411_s27 = sshll.u32 %s298_s23, 4  ;;  %s1395_s0 = scalar_lea.sflag [#allocation5], %s2350_s29  ;;  %s2384_s27 = int_to_ptr.vmem [resolvable:$true] %s1411_s27 }
  0x9d   : > { %v412_v12 = vsub.f32 %v2359_v1, %v320_v4  ;;  %v830_v33 = vand.u32 4294901760, %v819_v31  ;;  %v915_v35 = vsub.f32 %v818_v30, %v827_v32  ;;  %v1369_v30 = vld [vmem:[%s269_s5] sm:$0xff]  ;;  %s1979_s2 = scalar_lea.vmem %s2384_s27, 1024  ;;  %s2077_s11 = smov [#allocation10]  }
  0x9e   : > { %v384_v13 = vsub.f32 %v311_v5, %v383_v7  ;;  %1696 = vmatprep.subr.bf16.mxu0 %v1695_v9  ;;  %v394_v14 = vsub.f32 %v314_v8, %v393_v10  ;;  %v406_v15 = vand.u32 4294901760, %v405_v11  ;;  %p1980_p6 = scmp.ne.s32.totalorder %s2384_s27, %s1979_s2  ;;  %s1983_s6 = sshll.u32 %s2077_s11, 4  ;;  %s1984_s6 = int_to_ptr.vmem [resolvable:$false] %s1983_s6 }
  0x9f   : > { %v413_v16 = vand.u32 4294901760, %v412_v12  ;;  %1698 = vmatpush3.bf16.msra.mxu0 %v1695_v9  ;;  %v1703_v28 = vpack.c.bf16 %v412_v12, %v405_v11  ;;  %v1719_v34 = vpack.c.bf16 %v830_v33, %v827_v32  ;;  %v922_v36 = vsub.f32 %v819_v31, %v830_v33  ;;  %v1370_v31 = vld [vmem:[%s269_s5 + $0x8] sm:$0xff]  ;;  %v1371_v32 = vld [vmem:[%s269_s5 + $0x10] sm:$0xff]  ;;  %v1372_v33 = vld [vmem:[%s269_s5 + $0x18] sm:$0xff]  ;;  %s1985_s28 = scalar_lea.vmem %s1984_s6, 2048  ;;  %p1986_p12 = scmp.lt.s32.totalorder %s2384_s27, %s1984_s6 }
  0xa0   : > { %v385_v17 = vand.u32 4294901760, %v384_v13  ;;  %v395_v18 = vand.u32 4294901760, %v394_v14  ;;  %v407_v19 = vsub.f32 %v405_v11, %v406_v15  ;;  %v916_v37 = vand.u32 4294901760, %v915_v35  ;;  %p1987_p1 = scmp.lt.s32.totalorder %s1985_s28, %s1979_s2 }
  0xa1   : > { %v414_v20 = vsub.f32 %v412_v12, %v413_v16  ;;  %v1711_v29 = vpack.c.bf16 %v413_v16, %v406_v15  ;;  %1720 = vmatprep.subr.bf16.mxu1 %v1719_v34  ;;  %v923_v38 = vand.u32 4294901760, %v922_v36  ;;  %v1727_v44 = vpack.c.bf16 %v922_v36, %v915_v35  ;;  %p2486_p13 = scmp.ne.s32.totalorder %s2485_s18, 0 }
  0xa2   : > { %v386_v21 = vsub.f32 %v384_v13, %v385_v17  ;;  %v396_v22 = vsub.f32 %v394_v14, %v395_v18  ;;  %v408_v23 = vand.u32 4294901760, %v407_v19  ;;  %1722 = vmatpush3.bf16.msra.mxu1 %v1719_v34  ;;  %v917_v39 = vsub.f32 %v915_v35, %v916_v37  ;;  %v1374_v35 = vld [vmem:[%s269_s5 + $0x28] sm:$0xff]  ;;  %p1988_p2 = por %p1987_p1, %p1986_p12 }
  0xa3   : > { %v415_v24 = vand.u32 4294901760, %v414_v20  ;;  %v924_v40 = vsub.f32 %v922_v36, %v923_v38  ;;  %v1735_v45 = vpack.c.bf16 %v923_v38, %v916_v37  ;;  %v1375_v36 = vld [vmem:[%s269_s5 + $0x30] sm:$0xff]  ;;  %v1376_v37 = vld [vmem:[%s269_s5 + $0x38] sm:$0xff]  ;;  %p1981_p11 = pnand %p1980_p6, %p2486_p13 }
  0xa4   : > { %v387_v25 = vand.u32 4294901760, %v386_v21  ;;  %v397_v26 = vand.u32 4294901760, %v396_v22  ;;  %v918_v41 = vand.u32 4294901760, %v917_v39 }
  0xa5   : > { %v1699_v27 = vpack.c.bf16 %v415_v24, %v408_v23  ;;  %v925_v42 = vand.u32 4294901760, %v924_v40  ;;  %p1982_p4 = pneg %p1981_p11 }
  0xa6   : > { %1615 = vmatprep.mubr.f32.mxu0 %v387_v25 }
  0xa7   : > { %1616 = vmatmul.mubr.f32.vlgmr.msra.gmra.mrb[0].mxu0 %v397_v26  ;;  %1700 = vmatprep.subr.bf16.mxu0 %v1699_v27  ;;  %v1723_v43 = vpack.c.bf16 %v925_v42, %v918_v41  ;;  %p1989_p5 = pnand %p1988_p2, %p1982_p4 }
  0xa8   : > { %1702 = vmatpush3.bf16.msra.mxu0 %v1699_v27  ;;  %1622 = vmatprep.mubr.f32.mxu0 %v383_v7 }
  0xa9   : > { %1704 = vmatprep.subr.bf16.mxu0 %v1703_v28  ;;  %1724 = vmatprep.subr.bf16.mxu1 %v1723_v43 }
  0xaf   : > { %1623 = vmatmul.mubr.f32.vlgmr.msra.gmra.mrb[0].mxu0 %v393_v10 }
  0xb0   : > { %1706 = vmatpush3.bf16.msra.mxu0 %v1703_v28  ;;  %1629 = vmatprep.mubr.f32.mxu0 %v384_v13 }
  0xb1   : > { %1708 = vmatprep.subr.bf16.mxu0 %v1695_v9 }
  0xb7   : > { %1630 = vmatmul.mubr.f32.vlgmr.msra.gmra.mrb[0].mxu0 %v394_v14 }
  0xb8   : > { %1710 = vmatpush3.bf16.msra.mxu0 %v1695_v9  ;;  %1636 = vmatprep.mubr.f32.mxu0 %v385_v17 }
  0xb9   : > { %1712 = vmatprep.subr.bf16.mxu0 %v1711_v29 }
  0xbf   : > { %1637 = vmatmul.mubr.f32.vlgmr.msra.gmra.mrb[0].mxu0 %v395_v18 }
  0xc0   : > { %1714 = vmatpush3.bf16.msra.mxu0 %v1711_v29  ;;  %1643 = vmatprep.mubr.f32.mxu0 %v383_v7 }
  0xc1   : > { %1716 = vmatprep.subr.bf16.mxu0 %v1695_v9 }
  0xc7   : > { %1644 = vmatmul.mubr.f32.vlgmr.msra.gmra.mrb[0].mxu0 %v393_v10 }
  0xc8   : > { %1718 = vmatpush3.bf16.msra.mxu0 %v1695_v9  ;;  %1650 = vmatprep.mubr.f32.mxu0 %v383_v7 }
  0xcf   : > { %1651 = vmatmul.mubr.f32.vlgmr.msra.gmra.mrb[0].mxu0 %v393_v10 }
 0x1a2   : > { %v1652_v46 = vpop.f32.mrb[0].mxu0 }
 0x1a3   : > { %v824_v47 = vsel %vm309_vm0, %v1652_v46, 0  ;;  %v808_v48 = vpop.f32.mrb[1].mxu0 }
 0x1a4   : > { %v903_v49 = vand.u32 4294901760, %v824_v47  ;;  %v821_v50 = vsel %vm309_vm0, %v808_v48, 0 }
 0x1a5   : > { %v893_v51 = vand.u32 4294901760, %v821_v50 }
 0x1a6   : > { %v904_v52 = vsub.f32 %v824_v47, %v903_v49 }
 0x1a7   : > { %v894_v53 = vsub.f32 %v821_v50, %v893_v51 }
 0x1a8   : > { %v905_v54 = vand.u32 4294901760, %v904_v52 }
 0x1a9   : > { %v895_v55 = vand.u32 4294901760, %v894_v53 }
 0x1aa   : > { %v906_v56 = vsub.f32 %v904_v52, %v905_v54 }
 0x1ab   : > { %v896_v57 = vsub.f32 %v894_v53, %v895_v55 }
 0x1ac   : > { %v907_v59 = vand.u32 4294901760, %v906_v56 }
 0x1ad   : > { %v897_v58 = vand.u32 4294901760, %v896_v57 }
 0x1af   : > { %1657 = vmatprep.mubr.f32.mxu1 %v897_v58 }
 0x1b0   : > { %1658 = vmatmul.mubr.f32.vlgmr.msra.gmra.mrb[0].mxu1 %v907_v59 }
 0x1b1   : > { %1726 = vmatpush3.bf16.msra.mxu1 %v1723_v43  ;;  %1664 = vmatprep.mubr.f32.mxu1 %v893_v51 }
 0x1b2   : > { %1728 = vmatprep.subr.bf16.mxu1 %v1727_v44 }
 0x1b8   : > { %1665 = vmatmul.mubr.f32.vlgmr.msra.gmra.mrb[0].mxu1 %v903_v49 }
 0x1b9   : > { %1730 = vmatpush3.bf16.msra.mxu1 %v1727_v44  ;;  %1671 = vmatprep.mubr.f32.mxu1 %v894_v53 }
 0x1ba   : > { %1732 = vmatprep.subr.bf16.mxu1 %v1719_v34 }
 0x1c0   : > { %1672 = vmatmul.mubr.f32.vlgmr.msra.gmra.mrb[0].mxu1 %v904_v52 }
 0x1c1   : > { %1734 = vmatpush3.bf16.msra.mxu1 %v1719_v34  ;;  %1678 = vmatprep.mubr.f32.mxu1 %v895_v55 }
 0x1c2   : > { %1736 = vmatprep.subr.bf16.mxu1 %v1735_v45 }
 0x1c8   : > { %1679 = vmatmul.mubr.f32.vlgmr.msra.gmra.mrb[0].mxu1 %v905_v54 }
 0x1c9   : > { %1738 = vmatpush3.bf16.msra.mxu1 %v1735_v45  ;;  %1685 = vmatprep.mubr.f32.mxu1 %v893_v51 }
 0x1ca   : > { %1740 = vmatprep.subr.bf16.mxu1 %v1719_v34 }
 0x1d0   : > { %1686 = vmatmul.mubr.f32.vlgmr.msra.gmra.mrb[0].mxu1 %v903_v49 }
 0x1d1   : > { %1742 = vmatpush3.bf16.msra.mxu1 %v1719_v34  ;;  %1692 = vmatprep.mubr.f32.mxu1 %v893_v51  ;;  %v1373_v34 = vld [vmem:[%s269_s5 + $0x20] sm:$0xff] }
 0x1d8   : > { %1693 = vmatmul.mubr.f32.vlgmr.msra.gmra.mrb[0].mxu1 %v903_v49 }
 0x2ab   : > { %v1694_v60 = vpop.f32.mrb[0].mxu1 }
 0x2ac   : > { %v1318_v61 = vpop.f32.mrb[1].mxu1  ;;  %v1329_v62 = vsel %vm309_vm0, %v1694_v60, inf  ;;  %v1341_v63 = vsel %vm309_vm0, %v1694_v60, -inf }
 0x2ad   : > { %v1340_v2 = vsel %vm309_vm0, %v1318_v61, -inf  ;;  %v1328_v3 = vsel %vm309_vm0, %v1318_v61, inf }
 0x2ae   : > { %v1330_v4 = vmin.f32 %v1328_v3, %v1329_v62  ;;  %v1342_v5 = vmax.f32 %v1340_v2, %v1341_v63 }
 0x2b0   : > { %1331 = vmin.xlane.f32.xlu0 %v1330_v4 }
 0x2b4   : > { %1343 = vmax.xlane.f32.xlu0 %v1342_v5 }
 0x33d   : > { %v1332_v6 = vpop.xlane.xlu0 %1331 }
 0x33e   : > { %v1333_v7 = vrot.slane %v1332_v6, 4 }
 0x340   : > { %v1334_v8 = vmin.f32 %v1332_v6, %v1333_v7 }
 0x341   : > { %v1344_v9 = vpop.xlane.xlu0 %1343 }
 0x342   : > { %v1335_v10 = vrot.slane %v1334_v8, 2  ;;  %v1345_v11 = vrot.slane %v1344_v9, 4 }
 0x344   : > { %v1346_v12 = vmax.f32 %v1344_v9, %v1345_v11  ;;  %v1336_v13 = vmin.f32 %v1334_v8, %v1335_v10 }
 0x346   : > { %v1347_v14 = vrot.slane %v1346_v12, 2  ;;  %v1337_v15 = vrot.slane %v1336_v13, 1 }
 0x348   : > { %v1348_v16 = vmax.f32 %v1346_v12, %v1347_v14  ;;  %v1338_v17 = vmin.f32 %v1336_v13, %v1337_v15 }
 0x34a   : > { %1763 = vpush %v1338_v17  ;;  %v1349_v18 = vrot.slane %v1348_v16, 1 }
 0x34c   : > { %v1350_v19 = vmax.f32 %v1348_v16, %v1349_v18 }
 0x34e   : > { %1765 = vpush %v1350_v19 }
 0x37b   : > { %s1764_s21 = spop %1763 }
 0x37c   : > { %v1357_v20 = vstv %s1764_s21 }
 0x37d   : > { %v1358_v21 = vsub.f32 %v1318_v61, %v1357_v20  ;;  %v1359_v22 = vsub.f32 %v1694_v60, %v1357_v20 }
 0x37f   : > { %s1766_s25 = spop %1765 }
 0x380   : > { %s1352_s22 = ssub.f32 %s1766_s25, %s1764_s21 }
 0x382   : > { %s1353_s12 = sadd.f32 1e-08, %s1352_s22 }
 0x384   : > { %v1354_v23 = vstv %s1353_s12 }
 0x385   : > { %1861 = vrcp.f32 %v1354_v23 }
 0x38f   : > { %v1862_v24 = vpop.eup %1861 }
 0x390   : > { %1767 = vpush %v1862_v24 }
 0x3c1   : > { %s1768_s30 = spop %1767 }
 0x3c2   : > { %v1360_v25 = vstv %s1768_s30 }
 0x3c3   : > { %v1361_v26 = vmul.f32 %v1360_v25, %v1358_v21  ;;  %v1362_v27 = vmul.f32 %v1360_v25, %v1359_v22 }
 0x3c5   : > { %v1363_v28 = vmax.f32 %v1361_v26, %v2357_v0  ;;  %v1364_v29 = vmax.f32 %v1362_v27, %v2359_v1 }
 0x3c7   : > { %1365 = vst.msk [vmem:[#allocation2] sm:$0xff] %vm309_vm0, %v1363_v28  ;;  %1366 = vst.msk [vmem:[#allocation2 + $0x8] sm:$0xff] %vm309_vm0, %v1364_v29 }
 0x3ce   : > { %v1367_v38 = vld [vmem:[#allocation2] sm:$0xff]  ;;  %v1368_v0 = vld [vmem:[#allocation2 + $0x8] sm:$0xff] }
 0x3cf   : > { %v1377_v39 = vmul.f32 %v1369_v30, %v1367_v38  ;;  %v1378_v1 = vmul.f32 %v1370_v31, %v1368_v0  ;;  %v1379_v40 = vmul.f32 %v1371_v32, %v1367_v38  ;;  %v1380_v41 = vmul.f32 %v1372_v33, %v1368_v0 }
 0x3d0   : > { %v1381_v42 = vmul.f32 %v1373_v34, %v1367_v38  ;;  %v1382_v43 = vmul.f32 %v1374_v35, %v1368_v0  ;;  %v1383_v44 = vmul.f32 %v1375_v36, %v1367_v38  ;;  %v1384_v45 = vmul.f32 %v1376_v37, %v1368_v0 }
 0x3d1   : > { %1386 = vst.msk [vmem:[%s298_s23] sm:$0xff] %vm309_vm0, %v1377_v39  ;;  %1387 = vst.msk [vmem:[%s298_s23 + $0x8] sm:$0xff] %vm309_vm0, %v1378_v1 }
 0x3d2   : > { %1388 = vst.msk [vmem:[%s298_s23 + $0x10] sm:$0xff] %vm309_vm0, %v1379_v40  ;;  %1389 = vst.msk [vmem:[%s298_s23 + $0x18] sm:$0xff] %vm309_vm0, %v1380_v41 }
 0x3d3   : > { %1390 = vst.msk [vmem:[%s298_s23 + $0x20] sm:$0xff] %vm309_vm0, %v1381_v42  ;;  %1391 = vst.msk [vmem:[%s298_s23 + $0x28] sm:$0xff] %vm309_vm0, %v1382_v43 }
 0x3d4   : > { %1392 = vst.msk [vmem:[%s298_s23 + $0x30] sm:$0xff] %vm309_vm0, %v1383_v44  ;;  %1393 = vst.msk [vmem:[%s298_s23 + $0x38] sm:$0xff] %vm309_vm0, %v1384_v45 }
 0x3d5   : > { %1992 = shalt.err (!%p1989_p5)
}
 0x3d6   : > { %s1993_s9 = scalar_lea.hbm %s2382_s14, 1024  ;;  %s1997_s25 = scalar_lea.hbm %s2445_s4, 2048 }
 0x3d7   : > { %p1994_p10 = scmp.ne.s32.totalorder %s2382_s14, %s1993_s9  ;;  %p1998_p9 = scmp.lt.u32.totalorder %s2382_s14, %s2445_s4 }
 0x3d8   : > { %p1999_p0 = scmp.lt.u32.totalorder %s1997_s25, %s1993_s9  ;;  %p2001_p6 = scmp.lt.u32.totalorder %s1993_s9, %s2382_s14 }
 0x3d9   : > { %p1995_p3 = pnand %p1994_p10, %p2486_p13 }
 0x3da   : > { %p2000_p8 = por %p1999_p0, %p1998_p9 }
 0x3db   : > { %p1996_p7 = pneg %p1995_p3 }
 0x3dc   : > { %p2002_p11 = por %p2001_p6, %p2000_p8 }
 0x3de   : > { %p2003_p4 = pnand %p2002_p11, %p1996_p7 }
 0x3e0   : > { %2006 = shalt.err (!%p2003_p4)
}
 0x3e1   : > { %s2078_s30 = smov 128   ;;  %s2079_s15 = smov 8  }
 0x3e2   : > { %1781 = dma.vmem_to_hbm [thread:$0]  (%p2486_p13), %s2384_s27, 1024, %s2382_s14, %s1395_s0, %s2078_s30, %s2078_s30, %s2079_s15  }
 0x3e3 PF: > { %s2487_s5 = sld [smem:[#allocation15_spill]]  ;;  %s2488_s24 = sld [smem:[#allocation17_spill]] }
 0x3e4   : > { %p2490_p1 = scmp.ge.s32.totalorder %s2069_s20, 2 }
 0x3e9   : > { %s1426_s23 = sand.u32 1, %s2487_s5   ;;  %p2489_p12 = scmp.ne.s32.totalorder %s2488_s24, 0 }
 0x3ea   : > { %s1427_s10 = scalar_lea.sflag [#allocation5], %s1426_s23 }
 0x3eb   : > { %p1798_p2 = pnand %p2490_p1, %p2489_p12 }
 0x3ed   : > { %2044 = dma.done.wait (!%p1798_p2), %s1427_s10, 1024  }
 0x3ee   : > { %2046 = vsyncadd (!%p1798_p2), %s1427_s10, 4294966272  ;;  %s19_s20 = sadd.s32 1, %s2069_s20   ;;  %s2491_s15 = smov %s2053_s16 }
 0x3ef   : > { %p16_p5 = scmp.ge.s32.totalorder %s19_s20, 4   ;;  %s2492_s16 = smov %s2057_s17 }
 0x3f0   : > { %s2493_s17 = smov %s2238_s26  ;;  %s2494_s18 = smov %s2065_s19 }
 0x3f1   : > { %s2495_s19 = smov %s2497_s7  ;;  %18 = sbr.rel (!%p16_p5) target bundleno = 9 (0x9), region = 103 }
 0x3f8   :  { %1432 = vsyncpa [#allocation4], 1 }
 0x3f9   :  { %1434 = vsyncpa [#allocation4 + $0x1], 1 }
 0x3fa   :  { %1435 = vsyncpa [#allocation7], 1 }
 0x3fb   :  { %1436 = vsyncpa [#allocation5], 1 }
 0x3fc   :  { %1438 = vsyncpa [#allocation5 + $0x1], 1 }

</bundles_post_ra>
